<compile_context>
chip_gen: v7x
topology: tpu7x:2x2x1
jax: 0.10.0
libtpu: 0.0.40
codegen_flags: <defaults>
</compile_context>

<pallas_src>
import jax
import jax.numpy as jnp
from jax.experimental import pallas as pl
from jax.experimental.pallas import tpu as pltpu


def _precision_cast_kernel(x_ref, o_ref):
    # Elementwise cast of the whole VMEM tile to the output dtype (VPU only).
    o_ref[...] = x_ref[...].astype(o_ref.dtype)


def _sublane_align(dtype) -> int:
    # Rows per packed vreg tile: 8 for 32-bit, 16 for 16-bit, 32 for 8-bit.
    itemsize = jnp.dtype(dtype).itemsize
    return 8 * max(1, 4 // itemsize)


def _round_up(x: int, m: int) -> int:
    return ((x + m - 1) // m) * m


# Tunables.
_SMALL_ELEMS = 64 * 1024          # below this, native (fusable) XLA cast wins
_MIN_TILE_BYTES = 1 << 20         # don't split into tiles smaller than ~1 MiB
_LANE_WIDTHS = (8192, 4096, 2048, 1024, 512, 256, 128)


def _chip_config():
    """Returns (per-buffer byte budget, scoped VMEM limit, min steps, want even steps)."""
    kind = ""
    try:
        kind = jax.devices()[0].device_kind.lower()
    except Exception:
        pass
    if "v7" in kind:
        # 3.2 TB/s HBM, 64 MiB physical VMEM, 2 TensorCores: big tiles, even
        # step counts, >= 8 steps total (>= 4 per core) when affordable.
        return 14 * 1024 * 1024, 48 * 1024 * 1024, 8, True
    if "v6" in kind:
        # 1.3-1.4 TB/s: a 4 MiB (in+out) tile is already past the roofline
        # knee; smaller tiles buy more steps for prologue/epilogue hiding.
        return 4 * 1024 * 1024, 32 * 1024 * 1024, 4, False
    # v5e / unknown: lowest HBM BW, keep tiles modest.
    return 3 * 1024 * 1024, 32 * 1024 * 1024, 4, False


def _choose_width(n: int, min_rows: int):
    # Lane-dense widths (multiples of 128) that also leave enough rows to form
    # >= min_rows of data; fall back to the largest lane-dense divisor; None if
    # n is not a multiple of 128 at all.
    for w in _LANE_WIDTHS:
        if n % w == 0 and n // w >= min_rows:
            return w
    for w in _LANE_WIDTHS:
        if n % w == 0:
            return w
    return None


def _choose_block_rows(rows, per_row_bytes, align, buf_budget, min_steps, want_even):
    budget_rows = max(align, (buf_budget // per_row_bytes) // align * align)
    total_bytes = rows * per_row_bytes
    max_steps_tile = max(1, total_bytes // _MIN_TILE_BYTES)   # keep tiles >= ~1 MiB
    max_steps_align = max(1, pl.cdiv(rows, align))

    # Enough steps for read/write DMA overlap (and to feed both v7x cores),
    # but never so many that per-step DMAs get tiny; the VMEM budget may
    # force more steps than the target.
    target = min(min_steps, max_steps_tile, max_steps_align)
    target = max(target, min(2, max_steps_align))
    target = max(target, pl.cdiv(rows, budget_rows))
    if want_even and target > 1 and target % 2:
        target += 1

    block = max(align, _round_up(pl.cdiv(rows, target), align))
    block = min(block, budget_rows, _round_up(rows, align))

    if want_even:
        steps = pl.cdiv(rows, block)
        if steps > 1 and steps % 2:
            # Alignment rounding broke the even split; nudge the block size
            # (bounded scan, staying within the VMEM budget).
            for delta in range(1, 65):
                for cand in (block - delta * align, block + delta * align):
                    if align <= cand <= budget_rows and pl.cdiv(rows, cand) % 2 == 0:
                        return cand
    return block


def embedding_precision_layer(x: jax.Array, precision=jnp.bfloat16) -> jax.Array:
    """Pallas equivalent of EmbeddingPrecisionLayer(precision).forward(x)."""
    precision = jnp.dtype(precision)
    if x.dtype == precision:
        return x  # torch .to() is a no-op for matching dtype

    n = x.size
    if n == 0 or n <= _SMALL_ELEMS:
        # Launch + DMA setup overhead (and lost XLA fusion) dwarf the work.
        return x.astype(precision)

    buf_budget, vmem_limit, min_steps, want_even = _chip_config()
    in_bytes = jnp.dtype(x.dtype).itemsize
    out_bytes = precision.itemsize
    align = max(_sublane_align(x.dtype), _sublane_align(precision))

    # Lane-dense slab: view the flat contiguous data as (rows, width) with
    # width a multiple of 128 that still leaves at least min_steps*align rows.
    # NOTE: assumes the default row-major layout (reshape is free there); a
    # non-default layout would force an HBM copy and should use the XLA cast.
    width = _choose_width(n, min_steps * align)
    if width is None:
        # Total size not a multiple of 128: a Pallas path would need masked
        # sub-128-lane stores; the native cast is strictly better here.
        return x.astype(precision)

    rows = n // width
    per_row_bytes = width * (in_bytes + out_bytes)
    block_rows = _choose_block_rows(
        rows, per_row_bytes, align, buf_budget, min_steps, want_even)
    grid = (pl.cdiv(rows, block_rows),)

    # NOTE: pl.Buffered(3) input multi-buffering for <=4-step grids is a
    # further few-% prologue-hiding win; left out pending verification of
    # pipeline_mode lowering on the deployed jax/mosaic version.

    x2d = x.reshape(rows, width)
    out2d = pl.pallas_call(
        _precision_cast_kernel,
        out_shape=jax.ShapeDtypeStruct((rows, width), precision),
        grid_spec=pltpu.PrefetchScalarGridSpec(
            num_scalar_prefetch=0,
            grid=grid,
            in_specs=[pl.BlockSpec((block_rows, width), lambda i: (i, 0))],
            out_specs=pl.BlockSpec((block_rows, width), lambda i: (i, 0)),
        ),
        compiler_params=pltpu.CompilerParams(
            dimension_semantics=("parallel",),
            vmem_limit_bytes=vmem_limit,
        ),
        cost_estimate=pl.CostEstimate(
            flops=0,
            transcendentals=0,
            bytes_accessed=n * (in_bytes + out_bytes),
        ),
    )(x2d)
    return out2d.reshape(x.shape)


if __name__ == "__main__":
    key = jax.random.PRNGKey(0)
    k1, k2, k3, k4 = jax.random.split(key, 4)

    # Main case: f32 -> bf16 through the Pallas kernel (lane-dense slab path).
    x = jax.random.normal(k1, (512, 256), dtype=jnp.float32)
    y = embedding_precision_layer(x, precision=jnp.bfloat16)
    jax.block_until_ready(y)
    assert y.dtype == jnp.bfloat16 and y.shape == x.shape
    assert bool(jnp.all(y == x.astype(jnp.bfloat16)))

    # Up-cast direction: bf16 -> f32 (different sublane packing on input side).
    x_up = jax.random.normal(k2, (384, 1024), dtype=jnp.bfloat16)
    y_up = embedding_precision_layer(x_up, precision=jnp.float32)
    jax.block_until_ready(y_up)
    assert y_up.dtype == jnp.float32 and y_up.shape == x_up.shape
    assert bool(jnp.all(y_up == x_up.astype(jnp.float32)))

    # Non-128-aligned total size: dispatches to the native XLA cast path.
    x_odd = jax.random.normal(k3, (300, 100), dtype=jnp.float32)
    y_odd = embedding_precision_layer(x_odd, precision=jnp.bfloat16)
    jax.block_until_ready(y_odd)
    assert y_odd.dtype == jnp.bfloat16 and y_odd.shape == x_odd.shape
    assert bool(jnp.all(y_odd == x_odd.astype(jnp.bfloat16)))

    # Tiny input: small-input fast path.
    x_small = jax.random.normal(k4, (8, 128), dtype=jnp.float32)
    y_small = embedding_precision_layer(x_small, precision=jnp.bfloat16)
    jax.block_until_ready(y_small)
    assert bool(jnp.all(y_small == x_small.astype(jnp.bfloat16)))

    print("KERNEL_OK")
</pallas_src>

<mosaic_0001>
module attributes {stable_mosaic.version = 11 : i64} {
  func.func @_precision_cast_kernel(%arg0: i32, %arg1: memref<32x2048xf32, #tpu.memory_space<vmem>>, %arg2: memref<32x2048xbf16, #tpu.memory_space<vmem>>) attributes {dimension_semantics = [#tpu.dimension_semantics<parallel>], iteration_bounds = array<i64: 2>, scalar_prefetch = 0 : i64, scratch_operands = 0 : i64, tpu.core_type = #tpu.core_type<tc>, window_params = [{transform_indices = @transform_0, window_bounds = array<i64: 32, 2048>}, {transform_indices = @transform_1, window_bounds = array<i64: 32, 2048>}]} {
    %c0 = arith.constant 0 : index
    %c0_0 = arith.constant 0 : index
    %0 = vector.load %arg1[%c0, %c0_0] : memref<32x2048xf32, #tpu.memory_space<vmem>>, vector<32x2048xf32>
    %1 = arith.truncf %0 : vector<32x2048xf32> to vector<32x2048xbf16>
    %c0_1 = arith.constant 0 : index
    %c0_2 = arith.constant 0 : index
    %2 = vector.load %arg2[%c0_1, %c0_2] : memref<32x2048xbf16, #tpu.memory_space<vmem>>, vector<32x2048xbf16>
    tpu.vector_store %arg2[%c0_1, %c0_2], %1 {strides = array<i32>} : memref<32x2048xbf16, #tpu.memory_space<vmem>>, vector<32x2048xbf16>,
    return
  }
  func.func @transform_0(%arg0: i32) -> (i32, i32) {
    %c0_i32 = arith.constant 0 : i32
    %c0_i32_0 = arith.constant 0 : i32
    return %arg0, %c0_i32 : i32, i32
  }
  func.func @transform_1(%arg0: i32) -> (i32, i32) {
    %c0_i32 = arith.constant 0 : i32
    %c0_i32_0 = arith.constant 0 : i32
    return %arg0, %c0_i32 : i32, i32
  }
}

</mosaic_0001>

<bundles_post_ra>
// kernel: tpu_custom_call.1
= control target key start
LH: loop header
LB: loop body
LE: loop exit
PB: predicated region body
PF: predicated region fallthrough
CT: control target
= control target key end

     0   :  { %6 = vsyncpa [#allocation3], 0  ;;  %s1026_s0 = inlined_call_operand.hbm [shape: f32[64,2048], index: 0, kind: input, shape index: {}]   ;;  %s1027_s1 = inlined_call_operand.hbm [shape: bf16[64,2048], index: 1, kind: output, shape index: {}]  }
   0x1   :  { %8 = vsyncpa [#allocation3 + $0x1], 0 }
   0x2   :  { %9 = vsyncpa [#allocation4], 0 }
   0x3   :  { %11 = vsyncpa [#allocation4 + $0x1], 0  ;;  %s762_s6 = smov 0   ;;  %s764_s7 = smov 0  }
   0x4   :  { %s766_s8 = smov 0   ;;  %s768_s9 = smov 0  }
   0x5 LB: > { %s783_s10 = sadd.s32 4294967295, %s744_s9   ;;  %s514_s11 = sadd.s32 4294967294, %s744_s9   ;;  %s744_s9 = sphi %s768_s9, %s1040_s9   ;;  %s740_s8 = sphi %s766_s8, %s1039_s8   ;;  %s736_s7 = sphi %s764_s7, %s1038_s7   ;;  %s732_s6 = sphi %s762_s6, %s1037_s6  }
   0x6   : > { %s787_s12 = sadd.s32 1, %s744_s9   ;;  %s24_s13 = sadd.s32 1, %s740_s8 }
   0x7   : > { %s21_s14 = ssub.s32 %s744_s9, %s787_s12  ;;  %p31_p0 = scmp.ne.s32.totalorder %s740_s8, %s736_s7 }
   0x8   : > { %p22_p1 = scmp.eq.s32.totalorder %s21_s14, 0  ;;  %p32_p2 = scmp.eq.s32.totalorder %s744_s9, 0 }
   0x9   : > { %p37_p3 = scmp.ne.s32.totalorder %s736_s7, %s732_s6  ;;  %p38_p4 = scmp.eq.s32.totalorder %s783_s10, 0 }
   0xa   : > { %s799_s15 = scalar_select %p22_p1, %s740_s8, %s24_s13  }
   0xb   : > { %p801_p5 = por %p32_p2, %p31_p0  ;;  %p805_p6 = por %p38_p4, %p37_p3 }
   0xc   : > { %p61_p7 = scmp.eq.s32.totalorder %s783_s10, 1  ;;  %p67_p8 = scmp.eq.s32.totalorder %s514_s11, 1 }
   0xd   : > { %p610_p10 = scmp.lt.s32.totalorder %s744_s9, 2  ;;  %s87_s20 = sand.u32 1, %s740_s8  }
   0xe   : > { %p812_p11 = por %p61_p7, %p31_p0  ;;  %p816_p12 = por %p67_p8, %p37_p3 }
   0xf   : > { %s563_s21 = sshll.u32 %s744_s9, 13  ;;  %s517_s22 = sshll.u32 %s87_s20, 9 }
  0x10   : > { %s1031_s18 = scalar_select %p812_p11, 1, 0 }
  0x11   : > { %s1032_s19 = scalar_select %p816_p12, 1, 0 }
  0x12   : > { %s825_s25 = scalar_lea.hbm %s1026_s0, %s563_s21  ;;  %s91_s26 = scalar_lea.vmem [#allocation2], %s517_s22 }
  0x13   : > { %s99_s27 = sshll.u32 %s91_s26, 4  ;;  %p829_p13 = pnand %p610_p10, %p801_p5  ;;  %s833_s27 = int_to_ptr.vmem [resolvable:$true] %s99_s27 }
  0x14   : > { %s835_s29 = scalar_lea.sflag [#allocation3], %s87_s20  ;;  %s648_s30 = scalar_lea.hbm %s825_s25, 8192 }
  0x15   : > { %p649_p0 = scmp.ne.s32.totalorder %s825_s25, %s648_s30  ;;  %p650_p1 = pneg %p829_p13 }
  0x16   : > { %s653_s4 = scalar_lea.hbm %s1026_s0, 16384  ;;  %p654_p4 = scmp.lt.u32.totalorder %s825_s25, %s1026_s0 }
  0x17   : > { %p651_p2 = pnand %p650_p1, %p649_p0  ;;  %p655_p5 = scmp.lt.u32.totalorder %s653_s4, %s648_s30 }
  0x18   : > { %p657_p8 = scmp.lt.u32.totalorder %s648_s30, %s825_s25 }
  0x19   : > { %p652_p3 = pneg %p651_p2  ;;  %p656_p7 = por %p655_p5, %p654_p4 }
  0x1b   : > { %p658_p10 = por %p657_p8, %p656_p7 }
  0x1d   : > { %p659_p9 = pnand %p658_p10, %p652_p3 }
  0x1f   : > { %662 = shalt.err (!%p659_p9)
}
  0x20   : > { %s663_s13 = scalar_lea.vmem %s833_s27, 8192  ;;  %s746_s14 = smov [#allocation2]  }
  0x21   : > { %p664_p0 = scmp.ne.s32.totalorder %s833_s27, %s663_s13  ;;  %s668_s16 = sshll.u32 %s746_s14, 4  ;;  %s669_s16 = int_to_ptr.vmem [resolvable:$false] %s668_s16 }
  0x22   : > { %s670_s20 = scalar_lea.vmem %s669_s16, 16384  ;;  %p671_p11 = scmp.lt.s32.totalorder %s833_s27, %s669_s16 }
  0x23   : > { %p666_p2 = pnand %p664_p0, %p650_p1  ;;  %p672_p4 = scmp.lt.s32.totalorder %s670_s20, %s663_s13 }
  0x25   : > { %p667_p12 = pneg %p666_p2  ;;  %p673_p5 = por %p672_p4, %p671_p11 }
  0x27   : > { %p674_p7 = pnand %p673_p5, %p667_p12 }
  0x29   : > { %677 = shalt.err (!%p674_p7)
}
  0x2a   : > { %s747_s21 = smov 2048   ;;  %s748_s22 = smov 128  }
  0x2b   : > { %605 = dma.hbm_to_vmem [thread:$0]  (!%p829_p13), %s825_s25, 8192, %s833_s27, %s835_s29, %s747_s21, %s747_s21, %s748_s22  }
  0x2c   : > { %p521_p9 = scmp.ge.s32.totalorder %s744_s9, 1  ;;  %p107_p1 = scmp.lt.s32.totalorder %s744_s9, 3 }
  0x2e   : > { %p108_p3 = pnand %p521_p9, %p107_p1 }
  0x2f   : > { %s866_s23 = sand.u32 (!%p108_p3), 1, %s736_s7  }
  0x30   : > { %111 = sbr.rel (%p108_p3) target bundleno = 97 (0x61), region = 24  ;;  %s522_s24 = sshll.u32 (!%p108_p3), %s866_s23, 9 }
  0x31   : > { %s114_s26 = scalar_lea.sflag (!%p108_p3), [#allocation3], %s866_s23  ;;  %s870_s30 = scalar_lea.vmem (!%p108_p3), [#allocation2], %s522_s24 }
  0x37   : > { %723 = dma.done.wait (%p805_p6), %s114_s26, 8192  }
  0x38   : > { %725 = vsyncadd (%p805_p6), %s114_s26, 4294959104  ;;  %s523_s25 = sshll.u32 %s866_s23, 8  ;;  %v138_v0 = vld [vmem:[%s870_s30] sm:$0xff]  ;;  %v139_v1 = vld [vmem:[%s870_s30 + $0x8] sm:$0xff]  ;;  %s597_s27 = sshll.u32 %s783_s10, 12 }
  0x39   : > { %v140_v2 = vld [vmem:[%s870_s30 + $0x10] sm:$0xff]  ;;  %v564_v3 = vpack.c.bf16 %v139_v1, %v138_v0  ;;  %v141_v4 = vld [vmem:[%s870_s30 + $0x18] sm:$0xff]  ;;  %v142_v5 = vld [vmem:[%s870_s30 + $0x20] sm:$0xff]  ;;  %s886_s17 = scalar_lea.vmem [#allocation5], %s523_s25  ;;  %s976_s2 = scalar_lea.hbm %s1027_s1, %s597_s27 }
  0x3a   : > { %v143_v6 = vld [vmem:[%s870_s30 + $0x28] sm:$0xff]  ;;  %v565_v7 = vpack.c.bf16 %v141_v4, %v140_v2  ;;  %v144_v9 = vld [vmem:[%s870_s30 + $0x30] sm:$0xff]  ;;  %v145_v10 = vld [vmem:[%s870_s30 + $0x38] sm:$0xff]  ;;  %s441_s28 = sshll.u32 %s886_s17, 4  ;;  %s427_s3 = scalar_lea.sflag [#allocation4], %s866_s23  ;;  %s978_s28 = int_to_ptr.vmem [resolvable:$true] %s441_s28 }
  0x3b   : > { %v566_v8 = vpack.c.bf16 %v143_v6, %v142_v5  ;;  %v146_v11 = vld [vmem:[%s870_s30 + $0x40] sm:$0xff]  ;;  %394 = vst [vmem:[%s886_s17] sm:$0xff] %v564_v3  ;;  %v567_v12 = vpack.c.bf16 %v145_v10, %v144_v9  ;;  %v147_v13 = vld [vmem:[%s870_s30 + $0x48] sm:$0xff]  ;;  %v148_v14 = vld [vmem:[%s870_s30 + $0x50] sm:$0xff]  ;;  %s678_s4 = scalar_lea.vmem %s978_s28, 4096  ;;  %p1034_p11 = scmp.ne.s32.totalorder %s1031_s18, 0 }
  0x3c   : > { %v149_v15 = vld [vmem:[%s870_s30 + $0x58] sm:$0xff]  ;;  %395 = vst [vmem:[%s886_s17 + $0x8] sm:$0xff] %v565_v7  ;;  %v568_v16 = vpack.c.bf16 %v147_v13, %v146_v11  ;;  %v150_v18 = vld [vmem:[%s870_s30 + $0x60] sm:$0xff]  ;;  %v151_v19 = vld [vmem:[%s870_s30 + $0x68] sm:$0xff]  ;;  %p679_p6 = scmp.ne.s32.totalorder %s978_s28, %s678_s4  ;;  %s749_s5 = smov [#allocation5]  }
  0x3d   : > { %396 = vst [vmem:[%s886_s17 + $0x10] sm:$0xff] %v566_v8  ;;  %v569_v17 = vpack.c.bf16 %v149_v15, %v148_v14  ;;  %v152_v20 = vld [vmem:[%s870_s30 + $0x70] sm:$0xff]  ;;  %397 = vst [vmem:[%s886_s17 + $0x18] sm:$0xff] %v567_v12  ;;  %v570_v21 = vpack.c.bf16 %v151_v19, %v150_v18  ;;  %v153_v22 = vld [vmem:[%s870_s30 + $0x78] sm:$0xff]  ;;  %s682_s11 = sshll.u32 %s749_s5, 4  ;;  %s683_s11 = int_to_ptr.vmem [resolvable:$false] %s682_s11 }
  0x3e   : > { %v154_v23 = vld [vmem:[%s870_s30 + $0x80] sm:$0xff]  ;;  %v155_v24 = vld [vmem:[%s870_s30 + $0x88] sm:$0xff]  ;;  %398 = vst [vmem:[%s886_s17 + $0x20] sm:$0xff] %v568_v16  ;;  %v571_v25 = vpack.c.bf16 %v153_v22, %v152_v20  ;;  %v156_v27 = vld [vmem:[%s870_s30 + $0x90] sm:$0xff]  ;;  %p680_p12 = pnand %p679_p6, %p1034_p11  ;;  %s684_s13 = scalar_lea.vmem %s683_s11, 8192 }
  0x3f   : > { %399 = vst [vmem:[%s886_s17 + $0x28] sm:$0xff] %v569_v17  ;;  %v572_v26 = vpack.c.bf16 %v155_v24, %v154_v23  ;;  %v157_v28 = vld [vmem:[%s870_s30 + $0x98] sm:$0xff]  ;;  %v158_v29 = vld [vmem:[%s870_s30 + $0xa0] sm:$0xff]  ;;  %400 = vst [vmem:[%s886_s17 + $0x30] sm:$0xff] %v570_v21  ;;  %p685_p8 = scmp.lt.s32.totalorder %s978_s28, %s683_s11  ;;  %p686_p10 = scmp.lt.s32.totalorder %s684_s13, %s678_s4 }
  0x40   : > { %v573_v30 = vpack.c.bf16 %v157_v28, %v156_v27  ;;  %v159_v31 = vld [vmem:[%s870_s30 + $0xa8] sm:$0xff]  ;;  %v160_v32 = vld [vmem:[%s870_s30 + $0xb0] sm:$0xff]  ;;  %v161_v33 = vld [vmem:[%s870_s30 + $0xb8] sm:$0xff]  ;;  %401 = vst [vmem:[%s886_s17 + $0x38] sm:$0xff] %v571_v25  ;;  %p681_p13 = pneg %p680_p12 }
  0x41   : > { %402 = vst [vmem:[%s886_s17 + $0x40] sm:$0xff] %v572_v26  ;;  %v574_v34 = vpack.c.bf16 %v159_v31, %v158_v29  ;;  %v575_v35 = vpack.c.bf16 %v161_v33, %v160_v32  ;;  %v162_v36 = vld [vmem:[%s870_s30 + $0xc0] sm:$0xff]  ;;  %v163_v37 = vld [vmem:[%s870_s30 + $0xc8] sm:$0xff]  ;;  %v164_v38 = vld [vmem:[%s870_s30 + $0xd0] sm:$0xff]  ;;  %p687_p0 = por %p686_p10, %p685_p8 }
  0x42   : > { %403 = vst [vmem:[%s886_s17 + $0x48] sm:$0xff] %v573_v30  ;;  %v576_v39 = vpack.c.bf16 %v163_v37, %v162_v36  ;;  %v165_v40 = vld [vmem:[%s870_s30 + $0xd8] sm:$0xff]  ;;  %v166_v41 = vld [vmem:[%s870_s30 + $0xe0] sm:$0xff]  ;;  %v167_v42 = vld [vmem:[%s870_s30 + $0xe8] sm:$0xff] }
  0x43   : > { %404 = vst [vmem:[%s886_s17 + $0x50] sm:$0xff] %v574_v34  ;;  %405 = vst [vmem:[%s886_s17 + $0x58] sm:$0xff] %v575_v35  ;;  %v577_v43 = vpack.c.bf16 %v165_v40, %v164_v38  ;;  %v578_v44 = vpack.c.bf16 %v167_v42, %v166_v41  ;;  %v168_v45 = vld [vmem:[%s870_s30 + $0xf0] sm:$0xff]  ;;  %v169_v46 = vld [vmem:[%s870_s30 + $0xf8] sm:$0xff]  ;;  %p688_p2 = pnand %p687_p0, %p681_p13 }
  0x44   : > { %v170_v47 = vld [vmem:[%s870_s30 + $0x100] sm:$0xff]  ;;  %406 = vst [vmem:[%s886_s17 + $0x60] sm:$0xff] %v576_v39  ;;  %v579_v48 = vpack.c.bf16 %v169_v46, %v168_v45  ;;  %v171_v49 = vld [vmem:[%s870_s30 + $0x108] sm:$0xff]  ;;  %v172_v50 = vld [vmem:[%s870_s30 + $0x110] sm:$0xff] }
  0x45   : > { %v173_v51 = vld [vmem:[%s870_s30 + $0x118] sm:$0xff]  ;;  %407 = vst [vmem:[%s886_s17 + $0x68] sm:$0xff] %v577_v43  ;;  %408 = vst [vmem:[%s886_s17 + $0x70] sm:$0xff] %v578_v44  ;;  %v580_v52 = vpack.c.bf16 %v171_v49, %v170_v47  ;;  %v174_v54 = vld [vmem:[%s870_s30 + $0x120] sm:$0xff] }
  0x46   : > { %v581_v53 = vpack.c.bf16 %v173_v51, %v172_v50  ;;  %v175_v55 = vld [vmem:[%s870_s30 + $0x128] sm:$0xff]  ;;  %v176_v56 = vld [vmem:[%s870_s30 + $0x130] sm:$0xff]  ;;  %409 = vst [vmem:[%s886_s17 + $0x78] sm:$0xff] %v579_v48  ;;  %v177_v58 = vld [vmem:[%s870_s30 + $0x138] sm:$0xff] }
  0x47   : > { %v582_v57 = vpack.c.bf16 %v175_v55, %v174_v54  ;;  %v178_v59 = vld [vmem:[%s870_s30 + $0x140] sm:$0xff]  ;;  %v179_v60 = vld [vmem:[%s870_s30 + $0x148] sm:$0xff]  ;;  %410 = vst [vmem:[%s886_s17 + $0x80] sm:$0xff] %v580_v52  ;;  %v583_v61 = vpack.c.bf16 %v177_v58, %v176_v56  ;;  %v180_v63 = vld [vmem:[%s870_s30 + $0x150] sm:$0xff] }
  0x48   : > { %411 = vst [vmem:[%s886_s17 + $0x88] sm:$0xff] %v581_v53  ;;  %v584_v62 = vpack.c.bf16 %v179_v60, %v178_v59  ;;  %v181_v0 = vld [vmem:[%s870_s30 + $0x158] sm:$0xff]  ;;  %v182_v1 = vld [vmem:[%s870_s30 + $0x160] sm:$0xff]  ;;  %v183_v3 = vld [vmem:[%s870_s30 + $0x168] sm:$0xff] }
  0x49   : > { %412 = vst [vmem:[%s886_s17 + $0x90] sm:$0xff] %v582_v57  ;;  %v585_v2 = vpack.c.bf16 %v181_v0, %v180_v63  ;;  %v184_v4 = vld [vmem:[%s870_s30 + $0x170] sm:$0xff]  ;;  %v185_v5 = vld [vmem:[%s870_s30 + $0x178] sm:$0xff]  ;;  %413 = vst [vmem:[%s886_s17 + $0x98] sm:$0xff] %v583_v61  ;;  %v586_v6 = vpack.c.bf16 %v183_v3, %v182_v1 }
  0x4a   : > { %414 = vst [vmem:[%s886_s17 + $0xa0] sm:$0xff] %v584_v62  ;;  %v587_v7 = vpack.c.bf16 %v185_v5, %v184_v4  ;;  %v186_v8 = vld [vmem:[%s870_s30 + $0x180] sm:$0xff]  ;;  %v187_v9 = vld [vmem:[%s870_s30 + $0x188] sm:$0xff]  ;;  %v188_v10 = vld [vmem:[%s870_s30 + $0x190] sm:$0xff] }
  0x4b   : > { %415 = vst [vmem:[%s886_s17 + $0xa8] sm:$0xff] %v585_v2  ;;  %v588_v11 = vpack.c.bf16 %v187_v9, %v186_v8  ;;  %v189_v12 = vld [vmem:[%s870_s30 + $0x198] sm:$0xff]  ;;  %v190_v13 = vld [vmem:[%s870_s30 + $0x1a0] sm:$0xff]  ;;  %v191_v14 = vld [vmem:[%s870_s30 + $0x1a8] sm:$0xff] }
  0x4c   : > { %416 = vst [vmem:[%s886_s17 + $0xb0] sm:$0xff] %v586_v6  ;;  %417 = vst [vmem:[%s886_s17 + $0xb8] sm:$0xff] %v587_v7  ;;  %v589_v15 = vpack.c.bf16 %v189_v12, %v188_v10  ;;  %v590_v16 = vpack.c.bf16 %v191_v14, %v190_v13  ;;  %v192_v17 = vld [vmem:[%s870_s30 + $0x1b0] sm:$0xff]  ;;  %v193_v18 = vld [vmem:[%s870_s30 + $0x1b8] sm:$0xff] }
  0x4d   : > { %v194_v19 = vld [vmem:[%s870_s30 + $0x1c0] sm:$0xff]  ;;  %418 = vst [vmem:[%s886_s17 + $0xc0] sm:$0xff] %v588_v11  ;;  %v591_v20 = vpack.c.bf16 %v193_v18, %v192_v17  ;;  %v195_v21 = vld [vmem:[%s870_s30 + $0x1c8] sm:$0xff]  ;;  %v196_v22 = vld [vmem:[%s870_s30 + $0x1d0] sm:$0xff] }
  0x4e   : > { %v197_v23 = vld [vmem:[%s870_s30 + $0x1d8] sm:$0xff]  ;;  %419 = vst [vmem:[%s886_s17 + $0xc8] sm:$0xff] %v589_v15  ;;  %420 = vst [vmem:[%s886_s17 + $0xd0] sm:$0xff] %v590_v16  ;;  %v592_v24 = vpack.c.bf16 %v195_v21, %v194_v19  ;;  %v198_v26 = vld [vmem:[%s870_s30 + $0x1e0] sm:$0xff] }
  0x4f   : > { %v593_v25 = vpack.c.bf16 %v197_v23, %v196_v22  ;;  %v199_v27 = vld [vmem:[%s870_s30 + $0x1e8] sm:$0xff]  ;;  %v200_v28 = vld [vmem:[%s870_s30 + $0x1f0] sm:$0xff]  ;;  %421 = vst [vmem:[%s886_s17 + $0xd8] sm:$0xff] %v591_v20  ;;  %v201_v30 = vld [vmem:[%s870_s30 + $0x1f8] sm:$0xff] }
  0x50   : > { %v594_v29 = vpack.c.bf16 %v199_v27, %v198_v26  ;;  %422 = vst [vmem:[%s886_s17 + $0xe0] sm:$0xff] %v592_v24  ;;  %v595_v31 = vpack.c.bf16 %v201_v30, %v200_v28 }
  0x51   : > { %423 = vst [vmem:[%s886_s17 + $0xe8] sm:$0xff] %v593_v25 }
  0x52   : > { %424 = vst [vmem:[%s886_s17 + $0xf0] sm:$0xff] %v594_v29  ;;  %425 = vst [vmem:[%s886_s17 + $0xf8] sm:$0xff] %v595_v31 }
  0x53   : > { %691 = shalt.err (!%p688_p2)
}
  0x54   : > { %s692_s14 = scalar_lea.hbm %s976_s2, 4096  ;;  %s696_s21 = scalar_lea.hbm %s1027_s1, 8192 }
  0x55   : > { %p693_p4 = scmp.ne.s32.totalorder %s976_s2, %s692_s14  ;;  %p697_p9 = scmp.lt.u32.totalorder %s976_s2, %s1027_s1 }
  0x56   : > { %p698_p1 = scmp.lt.u32.totalorder %s696_s21, %s692_s14  ;;  %p700_p6 = scmp.lt.u32.totalorder %s692_s14, %s976_s2 }
  0x57   : > { %p694_p5 = pnand %p693_p4, %p1034_p11 }
  0x58   : > { %p699_p3 = por %p698_p1, %p697_p9 }
  0x59   : > { %p695_p7 = pneg %p694_p5 }
  0x5a   : > { %p701_p12 = por %p700_p6, %p699_p3 }
  0x5c   : > { %p702_p13 = pnand %p701_p12, %p695_p7 }
  0x5e   : > { %705 = shalt.err (!%p702_p13)
}
  0x5f   : > { %s750_s26 = smov 1024   ;;  %s751_s30 = smov 64  }
  0x60   : > { %600 = dma.vmem_to_hbm [thread:$0]  (%p1034_p11), %s978_s28, 4096, %s976_s2, %s427_s3, %s750_s26, %s750_s26, %s751_s30  }
  0x61 PF: > { %s456_s25 = sand.u32 1, %s732_s6   ;;  %p1035_p8 = scmp.ne.s32.totalorder %s1032_s19, 0 }
  0x62   : > { %p1036_p10 = scmp.ge.s32.totalorder %s744_s9, 2  ;;  %s457_s17 = scalar_lea.sflag [#allocation4], %s456_s25 }
  0x64   : > { %p607_p0 = pnand %p1036_p10, %p1035_p8 }
  0x66   : > { %727 = dma.done.wait (!%p607_p0), %s457_s17, 4096  }
  0x67   : > { %729 = vsyncadd (!%p607_p0), %s457_s17, 4294963200  ;;  %p14_p2 = scmp.ge.s32.totalorder %s787_s12, 4   ;;  %s1037_s6 = smov %s736_s7 }
  0x68   : > { %s1038_s7 = smov %s740_s8  ;;  %s1039_s8 = smov %s799_s15 }
  0x69   : > { %s1040_s9 = smov %s787_s12  ;;  %16 = sbr.rel (!%p14_p2) target bundleno = 5 (0x5), region = 69 }
  0x70   :  { %462 = vsyncpa [#allocation3], 1 }
  0x71   :  { %464 = vsyncpa [#allocation3 + $0x1], 1 }
  0x72   :  { %465 = vsyncpa [#allocation4], 1 }
  0x73   :  { %467 = vsyncpa [#allocation4 + $0x1], 1 }

</bundles_post_ra>
